<compile_context>
chip_gen: v5e
topology: v5e:2x2
jax: 0.10.0
libtpu: 0.0.40
codegen_flags: <defaults>
</compile_context>

<pallas_src>
import functools

import jax
import jax.numpy as jnp
from jax.experimental import pallas as pl
from jax.experimental.pallas import tpu as pltpu

IN_F = 20      # input features
HID_F = 100    # hidden features (logical)
OUT_F = 50     # output features (logical)
HID_P = 128    # hidden features padded to a full lane width
OUT_P = 64     # output features padded to 64 lanes (full minor dim of output)

_LANE = 128
_SUB = 8


def _round_up(n, m):
    return ((n + m - 1) // m) * m


def _vmem_tile_bytes(rows, cols, itemsize=4):
    # VMEM footprint of one (rows, cols) f32 block under (8, 128) tiling.
    return _round_up(rows, _SUB) * _round_up(cols, _LANE) * itemsize


def _mlp_kernel(x_ref, w1_ref, b1_ref, w2_ref, b2_ref, o_ref, *, use_bf16):
    x = x_ref[...]
    w1 = w1_ref[...]
    if use_bf16:
        x = x.astype(jnp.bfloat16)
        w1 = w1.astype(jnp.bfloat16)
    # Layer 1: (tb, 20) @ (20, 128) -> (tb, 128); bias + ReLU on the VPU.
    h = jnp.dot(x, w1, preferred_element_type=jnp.float32)
    h = jnp.maximum(h + b1_ref[...], 0.0)
    w2 = w2_ref[...]
    if use_bf16:
        h = h.astype(jnp.bfloat16)
        w2 = w2.astype(jnp.bfloat16)
    # Layer 2: (tb, 128) @ (128, 64) -> (tb, 64); bias + ReLU.
    y = jnp.dot(h, w2, preferred_element_type=jnp.float32)
    y = jnp.maximum(y + b2_ref[...], 0.0)
    o_ref[...] = y.astype(o_ref.dtype)


def prepare_params(w1, b1, w2, b2, dtype=jnp.float32):
    """One-time padding of parameters into lane-dense VMEM-friendly slabs.

    w1: (20, 100), b1: (1, 100), w2: (100, 50), b2: (1, 50)
    (weights are stored transposed vs. PyTorch's (out, in) layout).
    Padding is exact: relu(0 + 0) = 0 in padded hidden lanes, and the padded
    rows of w2 are zero, so padded output lanes are relu(0 + 0) = 0.
    """
    w1p = jnp.zeros((IN_F, HID_P), dtype).at[:, :HID_F].set(w1.astype(dtype))
    b1p = jnp.zeros((1, HID_P), dtype).at[:, :HID_F].set(b1.astype(dtype))
    w2p = jnp.zeros((HID_P, OUT_P), dtype).at[:HID_F, :OUT_F].set(w2.astype(dtype))
    b2p = jnp.zeros((1, OUT_P), dtype).at[:, :OUT_F].set(b2.astype(dtype))
    return w1p, b1p, w2p, b2p


@functools.partial(jax.jit, static_argnames=("tile_b", "trim", "use_bf16"))
def encoder_forward(x, w1p, b1p, w2p, b2p, *, tile_b=4096, trim=True,
                    use_bf16=False):
    """Pallas forward pass for the Encoder MLP.

    x: (B, 20) float32; params pre-padded by prepare_params().
    Returns (B, 50) if trim=True (module semantics), else the (B, 64) padded
    slab (lets a downstream consumer fuse the lane trim and skip an HBM pass).
    """
    B, K = x.shape
    assert K == IN_F
    dtype = x.dtype

    # --- batch tile: multiple of 8 sublanes, >= 2 grid steps when possible ---
    tb = max(_SUB, _round_up(pl.cdiv(B, 2), _SUB))   # keep both v7x TCs busy
    tb = min(tile_b, tb)
    grid = (pl.cdiv(B, tb),)                          # ragged last block is OK

    x_spec = pl.BlockSpec((tb, IN_F), lambda i: (i, 0))
    out_spec = pl.BlockSpec((tb, OUT_P), lambda i: (i, 0))

    # Weights/biases: one full block, constant index_map -> VMEM-resident.
    def _resident(a):
        return pl.BlockSpec(a.shape, lambda i: (0, 0))

    # VMEM budget with lane/sublane-padded tile sizes; ~2x for double-buffering
    # plus headroom, capped at 32 MiB (safe on v7x's smaller scoped VMEM).
    tile_bytes = (2 * _vmem_tile_bytes(tb, IN_F)      # x, double-buffered
                  + 2 * _vmem_tile_bytes(tb, OUT_P)   # out, double-buffered
                  + _vmem_tile_bytes(tb, HID_P)       # f32 hidden intermediate
                  + 2 * (_vmem_tile_bytes(IN_F, HID_P) + _vmem_tile_bytes(1, HID_P)
                         + _vmem_tile_bytes(HID_P, OUT_P) + _vmem_tile_bytes(1, OUT_P)))
    vmem_limit = int(min(tile_bytes + (8 << 20), 32 << 20))

    out = pl.pallas_call(
        functools.partial(_mlp_kernel, use_bf16=use_bf16),
        out_shape=jax.ShapeDtypeStruct((B, OUT_P), dtype),
        grid=grid,
        in_specs=[x_spec, _resident(w1p), _resident(b1p),
                  _resident(w2p), _resident(b2p)],
        out_specs=out_spec,
        compiler_params=pltpu.CompilerParams(
            dimension_semantics=("parallel",),
            vmem_limit_bytes=vmem_limit),
    )(x, w1p, b1p, w2p, b2p)

    if trim:
        # Layout plumbing only: drop the 14 zero lanes to match module output.
        return out[:, :OUT_F]
    return out


def init_params(key):
    """Deterministic init matching PyTorch nn.Linear default (U[-1/sqrt(fan_in), +])."""
    k1, k2, k3, k4 = jax.random.split(key, 4)
    lim1 = 1.0 / jnp.sqrt(float(IN_F))
    lim2 = 1.0 / jnp.sqrt(float(HID_F))
    w1 = jax.random.uniform(k1, (IN_F, HID_F), jnp.float32, -lim1, lim1)
    b1 = jax.random.uniform(k2, (1, HID_F), jnp.float32, -lim1, lim1)
    w2 = jax.random.uniform(k3, (HID_F, OUT_F), jnp.float32, -lim2, lim2)
    b2 = jax.random.uniform(k4, (1, OUT_F), jnp.float32, -lim2, lim2)
    return w1, b1, w2, b2


if __name__ == "__main__":
    key = jax.random.PRNGKey(0)
    kx, kp = jax.random.split(key)
    B = 8
    x = jax.random.normal(kx, (B, IN_F), jnp.float32)
    w1, b1, w2, b2 = init_params(kp)

    # One-time parameter prep (hoisted out of the per-call forward).
    w1p, b1p, w2p, b2p = prepare_params(w1, b1, w2, b2)

    out = encoder_forward(x, w1p, b1p, w2p, b2p)
    out = jax.block_until_ready(out)

    # Reference check in plain JAX (same math as the PyTorch module).
    ref = jnp.maximum(jnp.maximum(x @ w1 + b1, 0.0) @ w2 + b2, 0.0)
    assert out.shape == (B, OUT_F)
    assert jnp.allclose(out, ref, atol=1e-5, rtol=1e-5)
    print("KERNEL_OK")
</pallas_src>

<mosaic_0001>
module attributes {stable_mosaic.version = 11 : i64} {
  func.func @_mlp_kernel(%arg0: i32, %arg1: memref<8x20xf32, #tpu.memory_space<vmem>>, %arg2: memref<20x128xf32, #tpu.memory_space<vmem>>, %arg3: memref<1x128xf32, #tpu.memory_space<vmem>>, %arg4: memref<128x64xf32, #tpu.memory_space<vmem>>, %arg5: memref<1x64xf32, #tpu.memory_space<vmem>>, %arg6: memref<8x64xf32, #tpu.memory_space<vmem>>) attributes {dimension_semantics = [#tpu.dimension_semantics<parallel>], iteration_bounds = array<i64: 1>, scalar_prefetch = 0 : i64, scratch_operands = 0 : i64, tpu.core_type = #tpu.core_type<tc>, window_params = [{transform_indices = @transform_0, window_bounds = array<i64: 8, 20>}, {pipeline_mode = #tpu.pipeline_mode<synchronous>, transform_indices = @transform_1, window_bounds = array<i64: 20, 128>}, {pipeline_mode = #tpu.pipeline_mode<synchronous>, transform_indices = @transform_2, window_bounds = array<i64: 1, 128>}, {pipeline_mode = #tpu.pipeline_mode<synchronous>, transform_indices = @transform_3, window_bounds = array<i64: 128, 64>}, {pipeline_mode = #tpu.pipeline_mode<synchronous>, transform_indices = @transform_4, window_bounds = array<i64: 1, 64>}, {transform_indices = @transform_5, window_bounds = array<i64: 8, 64>}]} {
    %c0 = arith.constant 0 : index
    %c0_0 = arith.constant 0 : index
    %0 = vector.load %arg1[%c0, %c0_0] : memref<8x20xf32, #tpu.memory_space<vmem>>, vector<8x20xf32>
    %c0_1 = arith.constant 0 : index
    %c0_2 = arith.constant 0 : index
    %1 = vector.load %arg2[%c0_1, %c0_2] : memref<20x128xf32, #tpu.memory_space<vmem>>, vector<20x128xf32>
    %cst = arith.constant dense<0.000000e+00> : vector<8x128xf32>
    %2 = tpu.matmul %0, %1, %cst {dimension_numbers = #tpu.dot_dimension_numbers<[1], [0], [0], [1], [0, 0, 1, 1], [], []>} : vector<8x20xf32>, vector<20x128xf32>, vector<8x128xf32> -> vector<8x128xf32>
    %c0_3 = arith.constant 0 : index
    %c0_4 = arith.constant 0 : index
    %3 = vector.load %arg3[%c0_3, %c0_4] : memref<1x128xf32, #tpu.memory_space<vmem>>, vector<1x128xf32>
    %4 = vector.broadcast %3 : vector<1x128xf32> to vector<8x128xf32>
    %5 = arith.addf %2, %4 : vector<8x128xf32>
    %cst_5 = arith.constant 0.000000e+00 : f32
    %6 = vector.broadcast %cst_5 : f32 to vector<8x128xf32>
    %7 = arith.maximumf %5, %6 : vector<8x128xf32>
    %c0_6 = arith.constant 0 : index
    %c0_7 = arith.constant 0 : index
    %8 = vector.load %arg4[%c0_6, %c0_7] : memref<128x64xf32, #tpu.memory_space<vmem>>, vector<128x64xf32>
    %cst_8 = arith.constant dense<0.000000e+00> : vector<8x64xf32>
    %9 = tpu.matmul %7, %8, %cst_8 {dimension_numbers = #tpu.dot_dimension_numbers<[1], [0], [0], [1], [0, 0, 1, 1], [], []>} : vector<8x128xf32>, vector<128x64xf32>, vector<8x64xf32> -> vector<8x64xf32>
    %c0_9 = arith.constant 0 : index
    %c0_10 = arith.constant 0 : index
    %10 = vector.load %arg5[%c0_9, %c0_10] : memref<1x64xf32, #tpu.memory_space<vmem>>, vector<1x64xf32>
    %11 = vector.broadcast %10 : vector<1x64xf32> to vector<8x64xf32>
    %12 = arith.addf %9, %11 : vector<8x64xf32>
    %cst_11 = arith.constant 0.000000e+00 : f32
    %13 = vector.broadcast %cst_11 : f32 to vector<8x64xf32>
    %14 = arith.maximumf %12, %13 : vector<8x64xf32>
    %c0_12 = arith.constant 0 : index
    %c0_13 = arith.constant 0 : index
    %15 = vector.load %arg6[%c0_12, %c0_13] : memref<8x64xf32, #tpu.memory_space<vmem>>, vector<8x64xf32>
    tpu.vector_store %arg6[%c0_12, %c0_13], %14 {strides = array<i32>} : memref<8x64xf32, #tpu.memory_space<vmem>>, vector<8x64xf32>,
    return
  }
  func.func @transform_0(%arg0: i32) -> (i32, i32) {
    %c0_i32 = arith.constant 0 : i32
    %c0_i32_0 = arith.constant 0 : i32
    return %arg0, %c0_i32 : i32, i32
  }
  func.func @transform_1(%arg0: i32) -> (i32, i32) {
    %c0_i32 = arith.constant 0 : i32
    %c0_i32_0 = arith.constant 0 : i32
    %c0_i32_1 = arith.constant 0 : i32
    return %c0_i32, %c0_i32_0 : i32, i32
  }
  func.func @transform_2(%arg0: i32) -> (i32, i32) {
    %c0_i32 = arith.constant 0 : i32
    %c0_i32_0 = arith.constant 0 : i32
    %c0_i32_1 = arith.constant 0 : i32
    return %c0_i32, %c0_i32_0 : i32, i32
  }
  func.func @transform_3(%arg0: i32) -> (i32, i32) {
    %c0_i32 = arith.constant 0 : i32
    %c0_i32_0 = arith.constant 0 : i32
    %c0_i32_1 = arith.constant 0 : i32
    return %c0_i32, %c0_i32_0 : i32, i32
  }
  func.func @transform_4(%arg0: i32) -> (i32, i32) {
    %c0_i32 = arith.constant 0 : i32
    %c0_i32_0 = arith.constant 0 : i32
    %c0_i32_1 = arith.constant 0 : i32
    return %c0_i32, %c0_i32_0 : i32, i32
  }
  func.func @transform_5(%arg0: i32) -> (i32, i32) {
    %c0_i32 = arith.constant 0 : i32
    %c0_i32_0 = arith.constant 0 : i32
    return %arg0, %c0_i32 : i32, i32
  }
}

</mosaic_0001>

<bundles_post_ra>
// kernel: encoder_forward.1
= control target key start
LH: loop header
LB: loop body
LE: loop exit
PB: predicated region body
PF: predicated region fallthrough
CT: control target
= control target key end

     0   :  { %vm33_vm0 = vcmask 1043456   ;;  %vm29_vm1 = vcmask 162816   ;;  %s248_s0 = inlined_call_operand.vmem [shape: f32[8,20], index: 0, kind: input, shape index: {}]   ;;  %s249_s1 = inlined_call_operand.vmem [shape: f32[20,128], index: 1, kind: input, shape index: {}]   ;;  %s250_s2 = inlined_call_operand.vmem [shape: f32[1,128], index: 2, kind: input, shape index: {}]   ;;  %s251_s3 = inlined_call_operand.vmem [shape: f32[128,64], index: 3, kind: input, shape index: {}]   ;;  %s252_s4 = inlined_call_operand.vmem [shape: f32[1,64], index: 4, kind: input, shape index: {}]   ;;  %s253_s5 = inlined_call_operand.hbm [shape: f32[8,64], index: 5, kind: output, shape index: {}]  }
   0x1   :  { %v24_v0 = vld [vmem:[%s249_s1 + $0x10] sm:$0xf]  ;;  %v23_v1 = vld [vmem:[%s249_s1 + $0x8] sm:$0xff]  ;;  %v73_v2 = vld [vmem:[%s251_s3 + $0x78] sm:$0xff] }
   0x2   :  { %117 = vmatpush.msk.msra.mxu0 %vm33_vm0, %v24_v0  ;;  %v72_v3 = vld [vmem:[%s251_s3 + $0x70] sm:$0xff]  ;;  %v22_v4 = vld [vmem:[%s249_s1] sm:$0xff]  ;;  %78 = vmatpush.msra.mxu1 %v73_v2  ;;  %v71_v6 = vld [vmem:[%s251_s3 + $0x68] sm:$0xff] }
   0x3   :  { %v21_v5 = vld [vmem:[%s248_s0] sm:$0xff] }
   0x4   :  { %51 = vmatpush.msra.mxu0 %v23_v1  ;;  %79 = vmatpush.msra.mxu1 %v72_v3  ;;  %v70_v7 = vld [vmem:[%s251_s3 + $0x60] sm:$0xff] }
   0x6   :  { %52 = vmatpush.msra.mxu0 %v22_v4  ;;  %80 = vmatpush.msra.mxu1 %v71_v6 }
   0x7   :  { %118 = vmatmul.msk.f32.vlgmr.msra.gmra.mxu0 %vm29_vm1, %v21_v5 }
   0x8   :  { %10 = vsyncpa [#allocation3], 0  ;;  %v69_v8 = vld [vmem:[%s251_s3 + $0x58] sm:$0xff]  ;;  %81 = vmatpush.msra.mxu1 %v70_v7  ;;  %v68_v9 = vld [vmem:[%s251_s3 + $0x50] sm:$0xff]  ;;  %s148_s9 = smov [#allocation2]   ;;  %vm99_vm2 = vcmask 523264  }
   0x9   :  { %v67_v10 = vld [vmem:[%s251_s3 + $0x48] sm:$0xff]  ;;  %v66_v11 = vld [vmem:[%s251_s3 + $0x40] sm:$0xff]  ;;  %v65_v12 = vld [vmem:[%s251_s3 + $0x38] sm:$0xff]  ;;  %s106_s0 = sshll.u32 %s148_s9, 4  ;;  %s107_s0 = int_to_ptr.vmem [resolvable:$true] %s106_s0 }
   0xa   :  { %82 = vmatpush.msra.mxu1 %v69_v8  ;;  %v64_v13 = vld [vmem:[%s251_s3 + $0x30] sm:$0xff]  ;;  %v63_v14 = vld [vmem:[%s251_s3 + $0x28] sm:$0xff]  ;;  %v62_v15 = vld [vmem:[%s251_s3 + $0x20] sm:$0xff] }
   0xb   :  { %v61_v16 = vld [vmem:[%s251_s3 + $0x18] sm:$0xff]  ;;  %v60_v17 = vld [vmem:[%s251_s3 + $0x10] sm:$0xff]  ;;  %v59_v18 = vld [vmem:[%s251_s3 + $0x8] sm:$0xff] }
   0xc   :  { %83 = vmatpush.msra.mxu1 %v68_v9  ;;  %v58_v19 = vld [vmem:[%s251_s3] sm:$0xff]  ;;  %s108_s3 = sshll.u32 %s253_s5, 4  ;;  %s109_s3 = int_to_ptr.hbm [resolvable:$true] %s108_s3 }
   0xd   :  { %v120_v20 = vld [vmem:[%s250_s2] ss:$0 sm:$0xff] }
   0xe   :  { %84 = vmatpush.msra.mxu1 %v67_v10  ;;  %v121_v24 = vld [vmem:[%s252_s4] ss:$0 sm:$0xff] }
  0x10   :  { %85 = vmatpush.msra.mxu1 %v66_v11 }
  0x12   :  { %86 = vmatpush.msra.mxu1 %v65_v12 }
  0x14   :  { %87 = vmatpush.msra.mxu1 %v64_v13 }
  0x16   :  { %88 = vmatpush.msra.mxu1 %v63_v14 }
  0x18   :  { %89 = vmatpush.msra.mxu1 %v62_v15 }
  0x1a   :  { %90 = vmatpush.msra.mxu1 %v61_v16 }
  0x1c   :  { %91 = vmatpush.msra.mxu1 %v60_v17 }
  0x1e   :  { %92 = vmatpush.msra.mxu1 %v59_v18 }
  0x20   :  { %93 = vmatpush.msra.mxu1 %v58_v19 }
  0x84   :  { %v54_v21 = vpop.f32.mrf.mxu0 }
  0x85   :  { %v55_v22 = vadd.f32 %v120_v20, %v54_v21 }
  0x87   :  { %v57_v23 = vmax.f32 %v55_v22, 0.0 }
  0x89   :  { %94 = vmatmul.f32.vlgmr.msra.gmra.mxu1 %v57_v23 }
 0x106   :  { %v95_v25 = vpop.f32.mrf.mxu1 }
 0x107   :  { %v96_v26 = vadd.f32 %v121_v24, %v95_v25 }
 0x109   :  { %v98_v27 = vmax.f32 %v96_v26, 0.0 }
 0x10b   :  { %100 = vst.msk [vmem:[#allocation2] sm:$0xff] %vm99_vm2, %v98_v27 }
 0x10c   :  { %111 = dma.vmem_to_hbm [thread:$0]  %s107_s0, 128, %s109_s3, [#allocation3]  }
 0x10d   :  { %146 = dma.done.wait [#allocation3], 128  }
 0x10e   :  { %147 = vsyncadd [#allocation3], 4294967168 }
 0x10f   :  { %116 = vsyncpa [#allocation3], 1 }

</bundles_post_ra>
